<compile_context>
chip_gen: v7x
topology: tpu7x:2x2x1
jax: 0.10.0
libtpu: 0.0.40
codegen_flags: <defaults>
</compile_context>

<pallas_src>
import jax
import jax.numpy as jnp
import numpy as np
from jax.experimental import pallas as pl
from jax.experimental.pallas import tpu as pltpu


def wide_linear_kernel(x_ref, w_ref, out_ref):
    # x_ref:   [D, TB]  features on sublanes, batch on lanes (lane-dense)
    # w_ref:   [D, 1]   fused weight (ones for sparse logits, W for dense)
    # out_ref: [1, TB]  lane-dense output (batch on lanes)
    # VPU broadcast-multiply + cross-sublane reduce; upcast in-kernel so bf16
    # inputs stay bf16 in HBM.
    x = x_ref[...].astype(jnp.float32)
    out_ref[...] = jnp.sum(x * w_ref[...], axis=0, keepdims=True)


def wide_linear_forward(sparse_cat, dense_vals, weight, *,
                        target_tile_bytes=2 * 1024 * 1024):
    """Wide / Linear forward.

    sparse_cat : [B, n_sparse] -- concatenated sparse + pooled varlen
                 linear embeddings (embedding_dim == out_dim == 1)
    dense_vals : [B, dense_len]
    weight     : [dense_len, 1] f32
    returns    : [B, 1] f32 linear logit
    """
    B, n_sparse = sparse_cat.shape
    dense_len, out_dim = weight.shape
    assert out_dim == 1  # TODO(synk): out_dim > 1 path (would need [out_dim, TB] output tiles)

    # Fuse sparse sum-pool into the dense reduction:
    #   sum(sparse, -1) + dense @ W  ==  [sparse, dense] @ [ones; W]
    # Build the fused input *directly* in lane-dense [D, B] form: XLA emits a
    # single fused transpose-copy; the [B, D] concat intermediate never hits
    # HBM.  Source dtype is preserved (kernel upcasts), so bf16 streams stay
    # bf16 in HBM.
    x_t = jnp.concatenate([sparse_cat.T, dense_vals.T], axis=0)                       # [D, B]
    w_full = jnp.concatenate(
        [jnp.ones((n_sparse, 1), jnp.float32), weight.astype(jnp.float32)], axis=0)   # [D, 1]
    D = n_sparse + dense_len
    itemsize = jnp.dtype(x_t.dtype).itemsize

    # --- batch tile: MiB-scale so per-grid-step overhead is amortized -------
    tb = max(128, (target_tile_bytes // (itemsize * D)) // 128 * 128)
    tb = min(tb, pl.cdiv(B, 128) * 128)             # never exceed (padded) batch
    # v7x megacore: keep at least 2 grid steps so "parallel" shards batch
    # tiles across both TensorCores instead of leaving one idle.
    if pl.cdiv(B, tb) < 2 and tb > 128:
        tb = max(128, pl.cdiv(pl.cdiv(B, 2), 128) * 128)
    grid = pl.cdiv(B, tb)   # ragged tail block is write-masked by Pallas; its
                            # lanes are never read back, so no explicit pad.

    # --- VMEM budget from the actual tile footprint --------------------------
    # 2x double-buffered x tile + 2x out tile + resident (padded) weight.
    vmem_needed = 2 * D * tb * itemsize + 2 * tb * 4 + 8 * 128 * 4
    vmem_limit = int(min(max(2 * vmem_needed, 16 * 1024 * 1024), 48 * 1024 * 1024))

    out_t = pl.pallas_call(
        wide_linear_kernel,
        out_shape=jax.ShapeDtypeStruct((1, B), jnp.float32),
        grid_spec=pltpu.PrefetchScalarGridSpec(
            num_scalar_prefetch=0,
            grid=(grid,),
            in_specs=[
                pl.BlockSpec((D, tb), lambda i: (0, i)),   # x tile, pipelined over batch
                pl.BlockSpec((D, 1), lambda i: (0, 0)),    # fused weight, VMEM-resident
            ],
            out_specs=pl.BlockSpec((1, tb), lambda i: (0, i)),
        ),
        compiler_params=pltpu.CompilerParams(
            dimension_semantics=("parallel",),             # megacore-shard batch on v7x
            vmem_limit_bytes=vmem_limit,
        ),
        cost_estimate=pl.CostEstimate(
            flops=2 * B * D,
            transcendentals=0,
            bytes_accessed=B * D * itemsize + B * 4 + D * 4,
        ),
    )(x_t, w_full)

    # [1, B] -> [B, 1] is a zero-cost row-major reshape (no transpose copy).
    return out_t.reshape(B, 1)


if __name__ == "__main__":
    key = jax.random.PRNGKey(0)
    init_std = 1e-4
    out_dim = 1
    B = 256

    # synthetic feature columns:
    #   3 SparseFeat (vocab 10/20/30), 1 VarLenSparseFeat (vocab 15, maxlen 4,
    #   masked mean pooling), 2 DenseFeat of dim 2 each -> dense_len = 4
    sparse_vocabs = [10, 20, 30]
    varlen_vocab, varlen_maxlen = 15, 4
    dense_dims = [2, 2]
    dense_len = sum(dense_dims)

    keys = jax.random.split(key, 11)

    # deterministic parameter init (N(0, init_std)), embedding_dim == out_dim == 1
    emb_tables = [init_std * jax.random.normal(keys[i], (v, out_dim), jnp.float32)
                  for i, v in enumerate(sparse_vocabs)]
    varlen_table = init_std * jax.random.normal(keys[3], (varlen_vocab, out_dim),
                                                jnp.float32)
    dense_weight = init_std * jax.random.normal(keys[4], (dense_len, out_dim),
                                                jnp.float32)

    # synthetic input X columns (sparse ids, varlen ids + lengths, dense values)
    sp_idx = [jax.random.randint(keys[5 + i], (B,), 0, v)
              for i, v in enumerate(sparse_vocabs)]
    vl_idx = jax.random.randint(keys[8], (B, varlen_maxlen), 0, varlen_vocab)
    vl_len = jax.random.randint(keys[9], (B,), 1, varlen_maxlen + 1)
    dense_x = jax.random.normal(keys[10], (B, dense_len), dtype=jnp.float32)

    # ---- glue: input_from_feature_columns equivalent (gathers + pooling) ----
    # TODO(synk): embedding gathers / varlen pooling stay in plain JAX; fusing
    # them into the kernel (scalar-prefetch ids + pl.Element row gather) would
    # remove the sparse_cat HBM round-trip at production batch sizes.
    sparse_emb_list = [emb_tables[i][sp_idx[i]] for i in range(len(sparse_vocabs))]  # [B,1] each
    vl_emb = varlen_table[vl_idx][..., 0]                   # [B, L]
    vl_mask = (jnp.arange(varlen_maxlen)[None, :] < vl_len[:, None]).astype(jnp.float32)
    vl_pooled = (jnp.sum(vl_emb * vl_mask, axis=1, keepdims=True)
                 / vl_len[:, None].astype(jnp.float32))     # [B, 1]  masked mean pooling
    sparse_cat = jnp.concatenate(sparse_emb_list + [vl_pooled], axis=-1)             # [B, 4]

    # ---- hot path in the Pallas kernel ----
    out = wide_linear_forward(sparse_cat, dense_x, dense_weight)
    out = jax.block_until_ready(out)

    # pure-JAX reference of the PyTorch forward semantics
    ref = (jnp.sum(sparse_cat, axis=-1, keepdims=True)
           + dense_x.astype(jnp.float32) @ dense_weight)
    assert out.shape == (B, out_dim)
    assert np.allclose(np.asarray(out), np.asarray(ref), atol=1e-6, rtol=1e-5)

    print("KERNEL_OK")
</pallas_src>

<mosaic_0001>
module attributes {stable_mosaic.version = 11 : i64} {
  func.func @wide_linear_kernel(%arg0: i32, %arg1: memref<8x128xf32, #tpu.memory_space<vmem>>, %arg2: memref<8x1xf32, #tpu.memory_space<vmem>>, %arg3: memref<1x128xf32, #tpu.memory_space<vmem>>) attributes {dimension_semantics = [#tpu.dimension_semantics<parallel>], iteration_bounds = array<i64: 2>, scalar_prefetch = 0 : i64, scratch_operands = 0 : i64, tpu.core_type = #tpu.core_type<tc>, window_params = [{transform_indices = @transform_0, window_bounds = array<i64: 8, 128>}, {pipeline_mode = #tpu.pipeline_mode<synchronous>, transform_indices = @transform_1, window_bounds = array<i64: 8, 1>}, {transform_indices = @transform_2, window_bounds = array<i64: 1, 128>}]} {
    %c0 = arith.constant 0 : index
    %c0_0 = arith.constant 0 : index
    %0 = vector.load %arg1[%c0, %c0_0] : memref<8x128xf32, #tpu.memory_space<vmem>>, vector<8x128xf32>
    %c0_1 = arith.constant 0 : index
    %c0_2 = arith.constant 0 : index
    %1 = vector.load %arg2[%c0_1, %c0_2] : memref<8x1xf32, #tpu.memory_space<vmem>>, vector<8x1xf32>
    %2 = vector.broadcast %1 : vector<8x1xf32> to vector<8x128xf32>
    %3 = arith.mulf %0, %2 : vector<8x128xf32>
    %cst = arith.constant dense<0.000000e+00> : vector<128xf32>
    %4 = vector.multi_reduction <add>, %3, %cst [0] : vector<8x128xf32> to vector<128xf32>
    %5 = vector.shape_cast %4 : vector<128xf32> to vector<1x128xf32>
    %c0_3 = arith.constant 0 : index
    %c0_4 = arith.constant 0 : index
    %6 = vector.load %arg3[%c0_3, %c0_4] : memref<1x128xf32, #tpu.memory_space<vmem>>, vector<1x128xf32>
    tpu.vector_store %arg3[%c0_3, %c0_4], %5 {strides = array<i32>} : memref<1x128xf32, #tpu.memory_space<vmem>>, vector<1x128xf32>,
    return
  }
  func.func @transform_0(%arg0: i32) -> (i32, i32) {
    %c0_i32 = arith.constant 0 : i32
    %c0_i32_0 = arith.constant 0 : i32
    return %c0_i32, %arg0 : i32, i32
  }
  func.func @transform_1(%arg0: i32) -> (i32, i32) {
    %c0_i32 = arith.constant 0 : i32
    %c0_i32_0 = arith.constant 0 : i32
    %c0_i32_1 = arith.constant 0 : i32
    return %c0_i32, %c0_i32_0 : i32, i32
  }
  func.func @transform_2(%arg0: i32) -> (i32, i32) {
    %c0_i32 = arith.constant 0 : i32
    %c0_i32_0 = arith.constant 0 : i32
    return %c0_i32, %arg0 : i32, i32
  }
}

</mosaic_0001>

<bundles_post_ra>
// kernel: tpu_custom_call.1
= control target key start
LH: loop header
LB: loop body
LE: loop exit
PB: predicated region body
PF: predicated region fallthrough
CT: control target
= control target key end

     0   :  { %7 = vsyncpa [#allocation3], 0  ;;  %s591_s0 = inlined_call_operand.hbm [shape: f32[8,256], index: 0, kind: input, shape index: {}]   ;;  %s592_s1 = inlined_call_operand.vmem [shape: f32[8,1], index: 1, kind: input, shape index: {}]   ;;  %s593_s2 = inlined_call_operand.hbm [shape: f32[1,256], index: 2, kind: output, shape index: {}]  }
   0x1   :  { %9 = vsyncpa [#allocation3 + $0x1], 0 }
   0x2   :  { %10 = vsyncpa [#allocation4], 0 }
   0x3   :  { %12 = vsyncpa [#allocation4 + $0x1], 0  ;;  %s426_s9 = smov 0   ;;  %s428_s10 = smov 0  }
   0x4   :  { %s430_s11 = smov 0   ;;  %s432_s12 = smov 0  }
   0x5 LB: > { %s447_s13 = sadd.s32 4294967295, %s406_s12   ;;  %s252_s14 = sadd.s32 4294967294, %s406_s12   ;;  %s406_s12 = sphi %s432_s12, %s608_s12   ;;  %s402_s11 = sphi %s430_s11, %s607_s11   ;;  %s398_s10 = sphi %s428_s10, %s606_s10   ;;  %s394_s9 = sphi %s426_s9, %s605_s9  }
   0x6   : > { %s451_s15 = sadd.s32 1, %s406_s12   ;;  %s25_s16 = sadd.s32 1, %s402_s11 }
   0x7   : > { %s22_s17 = ssub.s32 %s406_s12, %s451_s15  ;;  %p32_p0 = scmp.ne.s32.totalorder %s402_s11, %s398_s10 }
   0x8   : > { %p23_p1 = scmp.eq.s32.totalorder %s22_s17, 0  ;;  %p33_p2 = scmp.eq.s32.totalorder %s406_s12, 0 }
   0x9   : > { %p38_p3 = scmp.ne.s32.totalorder %s398_s10, %s394_s9  ;;  %p39_p4 = scmp.eq.s32.totalorder %s447_s13, 0 }
   0xa   : > { %s463_s18 = scalar_select %p23_p1, %s402_s11, %s25_s16  }
   0xb   : > { %p465_p5 = por %p33_p2, %p32_p0  ;;  %p469_p6 = por %p39_p4, %p38_p3 }
   0xc   : > { %p83_p7 = scmp.eq.s32.totalorder %s447_s13, 1  ;;  %p89_p8 = scmp.eq.s32.totalorder %s252_s14, 1 }
   0xd   : > { %p274_p10 = scmp.lt.s32.totalorder %s406_s12, 2  ;;  %s112_s23 = sand.u32 1, %s402_s11  }
   0xe   : > { %p476_p11 = por %p83_p7, %p32_p0  ;;  %p480_p12 = por %p89_p8, %p38_p3 }
   0xf   : > { %s256_s24 = sshll.u32 %s406_s12, 7  ;;  %s255_s25 = sshll.u32 %s112_s23, 3 }
  0x10   : > { %s597_s21 = scalar_select %p476_p11, 1, 0 }
  0x11   : > { %s598_s22 = scalar_select %p480_p12, 1, 0 }
  0x12   : > { %s489_s28 = scalar_lea.hbm %s591_s0, %s256_s24  ;;  %s116_s29 = scalar_lea.vmem [#allocation2], %s255_s25 }
  0x13   : > { %s123_s30 = sshll.u32 %s116_s29, 4  ;;  %p493_p13 = pnand %p274_p10, %p465_p5  ;;  %s497_s30 = int_to_ptr.vmem [resolvable:$true] %s123_s30 }
  0x14   : > { %s113_s4 = scalar_lea.sflag [#allocation3], %s112_s23  ;;  %s310_s5 = scalar_lea.hbm %s489_s28, 128 }
  0x15   : > { %p311_p2 = scmp.ne.s32.totalorder %s489_s28, %s310_s5  ;;  %p312_p3 = pneg %p493_p13 }
  0x16   : > { %s315_s8 = scalar_lea.hbm %s591_s0, 256  ;;  %p316_p5 = scmp.lt.u32.totalorder %s489_s28, %s591_s0 }
  0x17   : > { %p313_p4 = pnand %p312_p3, %p311_p2  ;;  %p317_p8 = scmp.lt.u32.totalorder %s315_s8, %s310_s5 }
  0x18   : > { %p319_p9 = scmp.lt.u32.totalorder %s310_s5, %s489_s28 }
  0x19   : > { %p314_p7 = pneg %p313_p4  ;;  %p318_p10 = por %p317_p8, %p316_p5 }
  0x1b   : > { %p320_p0 = por %p319_p9, %p318_p10 }
  0x1d   : > { %p321_p1 = pnand %p320_p0, %p314_p7 }
  0x1f   : > { %324 = shalt.err (!%p321_p1)
}
  0x20   : > { %s325_s17 = scalar_lea.vmem %s497_s30, 128  ;;  %s408_s19 = smov [#allocation2]  }
  0x21   : > { %p326_p2 = scmp.ne.s32.totalorder %s497_s30, %s325_s17  ;;  %s330_s23 = sshll.u32 %s408_s19, 4  ;;  %s331_s23 = int_to_ptr.vmem [resolvable:$false] %s330_s23 }
  0x22   : > { %s332_s24 = scalar_lea.vmem %s331_s23, 256  ;;  %p333_p11 = scmp.lt.s32.totalorder %s497_s30, %s331_s23 }
  0x23   : > { %p328_p4 = pnand %p326_p2, %p312_p3  ;;  %p334_p5 = scmp.lt.s32.totalorder %s332_s24, %s325_s17 }
  0x25   : > { %p329_p12 = pneg %p328_p4  ;;  %p335_p8 = por %p334_p5, %p333_p11 }
  0x27   : > { %p336_p9 = pnand %p335_p8, %p329_p12 }
  0x29   : > { %339 = shalt.err (!%p336_p9)
}
  0x2a   : > { %269 = dma.hbm_to_vmem [thread:$0]  (!%p493_p13), %s489_s28, 128, %s497_s30, %s113_s4  }
  0x2b   : > { %p600_p0 = scmp.lt.s32.totalorder %s406_s12, 3  ;;  %p601_p1 = scmp.ge.s32.totalorder %s406_s12, 1 }
  0x2d   : > { %p129_p3 = pnand %p601_p1, %p600_p0 }
  0x2e   : > { %s531_s25 = sand.u32 (!%p129_p3), 1, %s398_s10  }
  0x2f   : > { %132 = sbr.rel (%p129_p3) target bundleno = 213 (0xd5), region = 28  ;;  %s258_s26 = sshll.u32 (!%p129_p3), %s531_s25, 3 }
  0x30   : > { %s135_s27 = scalar_lea.sflag (!%p129_p3), [#allocation3], %s531_s25  ;;  %s138_s29 = scalar_lea.vmem (!%p129_p3), [#allocation2], %s258_s26 }
  0x36   : > { %385 = dma.done.wait (%p469_p6), %s135_s27, 128  }
  0x37   : > { %387 = vsyncadd (%p469_p6), %s135_s27, 4294967168  ;;  %v409_v0 = vmov 0   ;;  %v159_v1 = vld [vmem:[%s592_s1] sm:$0xff]  ;;  %s259_s20 = sshll.u32 %s447_s13, 4  ;;  %s157_s3 = scalar_lea.vmem [#allocation5], %s531_s25 }
  0x38   : > { %309 = vset.pattern.permute.xlu0 %v409_v0  ;;  %v158_v2 = vld [vmem:[%s138_s29] sm:$0xff]  ;;  %s186_s4 = sshll.u32 %s157_s3, 4  ;;  %s547_s7 = scalar_lea.hbm %s593_s2, %s259_s20  ;;  %s549_s4 = int_to_ptr.vmem [resolvable:$true] %s186_s4 }
  0x39   : > { %162 = vperm.xlu0 %309, %v159_v1   ;;  %s174_s8 = scalar_lea.sflag [#allocation4], %s531_s25  ;;  %s340_s14 = scalar_lea.vmem %s549_s4, 16 }
  0x3a   : > { %p341_p6 = scmp.ne.s32.totalorder %s549_s4, %s340_s14  ;;  %p602_p11 = scmp.ne.s32.totalorder %s597_s21, 0 }
  0x3b   : > { %s410_s13 = smov [#allocation5]  }
  0x3c   : > { %p342_p12 = pnand %p341_p6, %p602_p11  ;;  %s344_s16 = sshll.u32 %s410_s13, 4  ;;  %s345_s16 = int_to_ptr.vmem [resolvable:$false] %s344_s16 }
  0x3d   : > { %s346_s17 = scalar_lea.vmem %s345_s16, 32  ;;  %p347_p7 = scmp.lt.s32.totalorder %s549_s4, %s345_s16 }
  0x3e   : > { %p343_p13 = pneg %p342_p12  ;;  %p348_p10 = scmp.lt.s32.totalorder %s346_s17, %s340_s14 }
  0x40   : > { %p349_p2 = por %p348_p10, %p347_p7 }
  0x42   : > { %p350_p4 = pnand %p349_p2, %p343_p13 }
  0xb8   : > { %v163_v3 = vpop.permute.xlu0 %162 }
  0xb9   : > { %v165_v4 = vmul.f32 %v163_v3, %v158_v2 }
  0xbb   : > { %v166_v5 = vrot.slane %v165_v4, 4 }
  0xbd   : > { %v167_v6 = vadd.f32 %v166_v5, %v165_v4 }
  0xbf   : > { %v168_v7 = vrot.slane %v167_v6, 2 }
  0xc1   : > { %v169_v8 = vadd.f32 %v168_v7, %v167_v6 }
  0xc3   : > { %v170_v9 = vrot.slane %v169_v8, 1 }
  0xc5   : > { %v171_v10 = vadd.f32 %v170_v9, %v169_v8 }
  0xc7   : > { %172 = vst [vmem:[%s157_s3] sm:$0x1] %v171_v10 }
  0xc8   : > { %353 = shalt.err (!%p350_p4)
}
  0xc9   : > { %s354_s19 = scalar_lea.hbm %s547_s7, 16  ;;  %s358_s25 = scalar_lea.hbm %s593_s2, 32 }
  0xca   : > { %p355_p5 = scmp.ne.s32.totalorder %s547_s7, %s354_s19  ;;  %p359_p0 = scmp.lt.u32.totalorder %s547_s7, %s593_s2 }
  0xcb   : > { %p360_p1 = scmp.lt.u32.totalorder %s358_s25, %s354_s19  ;;  %p362_p6 = scmp.lt.u32.totalorder %s354_s19, %s547_s7 }
  0xcc   : > { %p356_p8 = pnand %p355_p5, %p602_p11 }
  0xcd   : > { %p361_p3 = por %p360_p1, %p359_p0 }
  0xce   : > { %p357_p9 = pneg %p356_p8 }
  0xcf   : > { %p363_p12 = por %p362_p6, %p361_p3 }
  0xd1   : > { %p364_p13 = pnand %p363_p12, %p357_p9 }
  0xd3   : > { %367 = shalt.err (!%p364_p13)
}
  0xd4   : > { %264 = dma.vmem_to_hbm [thread:$0]  (%p602_p11), %s549_s4, 16, %s547_s7, %s174_s8  }
  0xd5 PF: > { %s198_s29 = sand.u32 1, %s394_s9   ;;  %p603_p7 = scmp.ne.s32.totalorder %s598_s22, 0 }
  0xd6   : > { %p604_p10 = scmp.ge.s32.totalorder %s406_s12, 2  ;;  %s199_s28 = scalar_lea.sflag [#allocation4], %s198_s29 }
  0xd8   : > { %p271_p2 = pnand %p604_p10, %p603_p7 }
  0xda   : > { %389 = dma.done.wait (!%p271_p2), %s199_s28, 16  }
  0xdb   : > { %391 = vsyncadd (!%p271_p2), %s199_s28, 4294967280  ;;  %p15_p4 = scmp.ge.s32.totalorder %s451_s15, 4   ;;  %s605_s9 = smov %s398_s10 }
  0xdc   : > { %s606_s10 = smov %s402_s11  ;;  %s607_s11 = smov %s463_s18 }
  0xdd   : > { %s608_s12 = smov %s451_s15  ;;  %17 = sbr.rel (!%p15_p4) target bundleno = 5 (0x5), region = 73 }
  0xe4   :  { %203 = vsyncpa [#allocation3], 1 }
  0xe5   :  { %205 = vsyncpa [#allocation3 + $0x1], 1 }
  0xe6   :  { %206 = vsyncpa [#allocation4], 1 }
  0xe7   :  { %208 = vsyncpa [#allocation4 + $0x1], 1 }

</bundles_post_ra>
